<compile_context>
chip_gen: v7x
topology: tpu7x:2x2x1
jax: 0.10.0
libtpu: 0.0.40
codegen_flags: <defaults>
</compile_context>

<pallas_src>
import functools

import jax
import jax.numpy as jnp
from jax.experimental import pallas as pl
from jax.experimental.pallas import tpu as pltpu


def _round_up(x, m):
    return (x + m - 1) // m * m


def _vmem_capacity_bytes():
    """Per-core VMEM capacity; falls back to the smallest (v7x: 64 MiB)."""
    try:
        return int(pltpu.get_tpu_info().vmem_capacity_bytes)
    except Exception:
        return 64 << 20


def _auto_tile_p(b_pad, d, itemsize, p_cols, vmem_bytes):
    """Pick the prototype tile width from the device VMEM budget."""
    resident = b_pad * (d * itemsize + 8)                # feats + labels + bias (x1)
    budget = int(vmem_bytes * 0.7) - resident - (4 << 20)
    # streamed prototype double-buffer + ~4 live f32 [b_pad, tile] temporaries
    per_col = 2 * (d * itemsize + 4) + 4 * b_pad * 4 + 32
    cols = budget // max(per_col, 1)
    tile = (cols // 128) * 128
    return int(max(128, min(tile, 1024, p_cols)))


def _supcon_mean_loss_kernel(feats_ref, protos_ref, flab_ref, plab_ref,
                             bias_ref, loss_ref, used_ref, *, base_temperature):
    # features [B_pad, D] (resident) x prototypes tile [TILE_P, D] (streamed).
    # 1/temperature is already folded into the prototypes.
    # pdf = feats @ protos.T -> [B_pad, TILE_P]; MXU with f32 accumulation.
    pdf = jax.lax.dot_general(
        feats_ref[...], protos_ref[...],
        dimension_numbers=(((1,), (1,)), ((), ())),
        preferred_element_type=jnp.float32)
    # Additive padding bias: 0 on valid batch rows, -1e30 (finite) on padded
    # rows -> exp underflows to 0, and 0 * (-1e30) = 0 stays NaN-free.
    pdf = pdf + bias_ref[...]

    # Positive-pair mask.  Sentinels (-1 padded features, -2 padded
    # prototypes) can never equal a real (>= 0) label, so no extra AND.
    mask = (flab_ref[...] == plab_ref[...]).astype(jnp.float32)   # [B_pad, TILE_P]

    # Batch-axis (sublane) reductions -> lane-dense [1, TILE_P] statistics.
    col_max = jnp.max(pdf, axis=0, keepdims=True)
    # TODO(synk): bf16 exp would ~double EUP throughput on v6e/v7x; kept f32
    # because temperature=0.01 makes the logits precision-sensitive.
    exps = jnp.exp(pdf - col_max)                                 # pads -> 0
    log_sum_exp = jnp.log(jnp.sum(exps, axis=0, keepdims=True)) + col_max

    mask_sum = jnp.sum(mask, axis=0, keepdims=True)
    used = (mask_sum > 0).astype(jnp.float32)
    pos_logit_sum = jnp.sum(mask * pdf, axis=0, keepdims=True)

    # mean_log_prob_pos = sum(mask*log_prob)/mask_sum with
    # sum(mask*log_prob) = sum(mask*pdf) - mask_sum * logsumexp(pdf).
    inv_mask_sum = pl.reciprocal(jnp.maximum(mask_sum, 1.0), approx=False)
    mean_log_prob_pos = (pos_logit_sum - mask_sum * log_sum_exp) * inv_mask_sum

    loss_ref[...] = used * (-base_temperature) * mean_log_prob_pos
    used_ref[...] = used


def supcon_mean_loss(features, labels, prototypes, prototypes_labels,
                     temperature=0.01, base_temperature=1.0,
                     tile_p=None, dot_dtype=jnp.float32):
    """Pallas implementation of SupConMeanLoss.forward.

    Assumes class labels are non-negative integers (negative values are
    reserved as padding sentinels).  Returns NaN if no prototype shares a
    label with any feature (matches the torch behavior).
    """
    if features.ndim < 3:
        raise ValueError("`features` needs to be [bsz, n_views, ...]")
    bsz = features.shape[0]
    feats = features.reshape(bsz, features.shape[1], -1)
    # TODO(synk): only n_views == 1 is supported (torch path does .squeeze(1)).
    assert feats.shape[1] == 1, "only n_views == 1 is supported"
    feats = feats[:, 0, :]                               # [B, D]

    P, D = prototypes.shape
    assert feats.shape[1] == D, "feature dim must match prototype dim"

    itemsize = jnp.dtype(dot_dtype).itemsize
    b_pad = _round_up(bsz, 8)                            # sublane-major batch axis
    p_cols = _round_up(P, 128)                           # prototype lane groups
    vmem_cap = _vmem_capacity_bytes()

    if tile_p is None:
        tile_p = _auto_tile_p(b_pad, D, itemsize, p_cols, vmem_cap)
    tile_p = max(128, min(_round_up(int(tile_p), 128), p_cols))
    n_groups = p_cols // 128
    if tile_p >= p_cols and n_groups >= 2:
        # Keep >= 2 grid tiles so the "parallel" prototype axis can land on
        # both TensorCores (v7x megacore); harmless elsewhere.
        tile_p = ((n_groups + 1) // 2) * 128
    p_pad = _round_up(P, tile_p)
    num_tiles = p_pad // tile_p

    # --- operand packing -----------------------------------------------------
    inv_temperature = float(1.0 / temperature)
    feats_p = jnp.zeros((b_pad, D), dot_dtype).at[:bsz].set(feats.astype(dot_dtype))
    protos_p = jnp.zeros((p_pad, D), dot_dtype).at[:P].set(
        (prototypes.astype(jnp.float32) * inv_temperature).astype(dot_dtype))
    flab = jnp.full((b_pad, 1), -1, jnp.int32).at[:bsz, 0].set(
        labels.reshape(-1).astype(jnp.int32))
    plab = jnp.full((1, p_pad), -2, jnp.int32).at[0, :P].set(
        prototypes_labels.reshape(-1).astype(jnp.int32))
    bias = jnp.full((b_pad, 1), -1e30, jnp.float32).at[:bsz].set(0.0)

    kernel = functools.partial(_supcon_mean_loss_kernel,
                               base_temperature=float(base_temperature))

    # VMEM budget: single-buffered resident block + double-buffered prototype
    # stream + f32 temporaries, clamped under the physical per-core capacity.
    est = (b_pad * (D * itemsize + 8)
           + 2 * tile_p * (D * itemsize + 4)
           + 6 * b_pad * tile_p * 4
           + 4 * 2 * tile_p * 4
           + (2 << 20))
    vmem_limit = int(min(max(est, 32 << 20), int(vmem_cap * 0.9)))

    grid_spec = pltpu.PrefetchScalarGridSpec(
        num_scalar_prefetch=0,
        grid=(num_tiles,),
        in_specs=[
            pl.BlockSpec((b_pad, D), lambda i: (0, 0),
                         pipeline_mode=pl.Buffered(1)),        # features (resident)
            pl.BlockSpec((tile_p, D), lambda i: (i, 0)),       # prototypes (streamed)
            pl.BlockSpec((b_pad, 1), lambda i: (0, 0),
                         pipeline_mode=pl.Buffered(1)),        # feature labels (resident)
            pl.BlockSpec((1, tile_p), lambda i: (0, i)),       # prototype labels (streamed)
            pl.BlockSpec((b_pad, 1), lambda i: (0, 0),
                         pipeline_mode=pl.Buffered(1)),        # batch-pad bias (resident)
        ],
        out_specs=[
            pl.BlockSpec((1, tile_p), lambda i: (0, i)),       # per-prototype loss
            pl.BlockSpec((1, tile_p), lambda i: (0, i)),       # per-prototype used flag
        ],
    )

    bytes_in = ((b_pad + p_pad) * D * itemsize + (b_pad + p_pad) * 4 + b_pad * 4)
    cost = pl.CostEstimate(flops=int(2 * b_pad * p_pad * D),
                           transcendentals=int(b_pad * p_pad),
                           bytes_accessed=int(bytes_in + 2 * p_pad * 4))

    loss_vec, used_vec = pl.pallas_call(
        kernel,
        out_shape=(jax.ShapeDtypeStruct((1, p_pad), jnp.float32),
                   jax.ShapeDtypeStruct((1, p_pad), jnp.float32)),
        grid_spec=grid_spec,
        compiler_params=pltpu.CompilerParams(
            dimension_semantics=("parallel",),
            vmem_limit_bytes=vmem_limit),
        cost_estimate=cost,
    )(feats_p, protos_p, flab, plab, bias)

    return jnp.sum(loss_vec) / jnp.sum(used_vec)


def supcon_mean_loss_ref(features, labels, prototypes, prototypes_labels,
                         temperature=0.01, base_temperature=1.0):
    """Plain-JAX (f32) reference mirroring the PyTorch forward."""
    bsz = features.shape[0]
    feats = features.reshape(bsz, features.shape[1], -1)[:, 0, :]
    mask = (prototypes_labels.reshape(-1, 1) == labels.reshape(1, -1)).astype(jnp.float32)
    pdf = jnp.matmul(prototypes, feats.T,
                     precision=jax.lax.Precision.HIGHEST) / temperature
    logits = pdf - jnp.max(jnp.max(pdf, axis=1, keepdims=True))
    log_prob = logits - jnp.log(jnp.sum(jnp.exp(logits), axis=1, keepdims=True))
    mask_sum = mask.sum(1)
    used = mask_sum > 0
    mlpp = (mask * log_prob).sum(1) / jnp.where(used, mask_sum, 1.0)
    loss_rows = -base_temperature * mlpp
    return jnp.sum(jnp.where(used, loss_rows, 0.0)) / jnp.sum(used)


if __name__ == "__main__":
    key = jax.random.PRNGKey(0)
    k_f, k_p, k_l, k_f2, k_p2, k_l2 = jax.random.split(key, 6)

    # --- test 1: tiny shapes, single prototype tile ------------------------
    B, NV, H, W = 8, 1, 4, 8          # features [bsz, n_views, 4, 8] -> D = 32
    D = H * W
    P, NUM_CLASSES = 16, 4
    # small scale keeps exp() well-conditioned with temperature=0.01
    features = 0.1 * jax.random.normal(k_f, (B, NV, H, W), dtype=jnp.float32)
    prototypes = 0.1 * jax.random.normal(k_p, (P, D), dtype=jnp.float32)
    labels = jax.random.randint(k_l, (B,), 0, NUM_CLASSES, dtype=jnp.int32)
    prototypes_labels = jnp.arange(P, dtype=jnp.int32) % NUM_CLASSES

    ref1 = supcon_mean_loss_ref(features, labels, prototypes, prototypes_labels)
    out1 = supcon_mean_loss(features, labels, prototypes, prototypes_labels)
    jax.block_until_ready(out1)
    assert jnp.allclose(out1, ref1, rtol=2e-2, atol=2e-2), (out1, ref1)

    # bf16-operand MXU path (accumulation / softmax stay f32): looser tolerance.
    out1_bf16 = supcon_mean_loss(features, labels, prototypes, prototypes_labels,
                                 dot_dtype=jnp.bfloat16)
    jax.block_until_ready(out1_bf16)
    assert jnp.allclose(out1_bf16, ref1, rtol=5e-2, atol=5e-2), (out1_bf16, ref1)

    # --- test 2: multi-tile prototype axis + padded batch rows --------------
    B2, P2, NUM_CLASSES2 = 10, 300, 7          # b_pad=16 (padding), p_pad>=384
    features2 = 0.1 * jax.random.normal(k_f2, (B2, NV, H, W), dtype=jnp.float32)
    prototypes2 = 0.1 * jax.random.normal(k_p2, (P2, D), dtype=jnp.float32)
    labels2 = jax.random.randint(k_l2, (B2,), 0, NUM_CLASSES2, dtype=jnp.int32)
    prototypes_labels2 = jnp.arange(P2, dtype=jnp.int32) % NUM_CLASSES2

    ref2 = supcon_mean_loss_ref(features2, labels2, prototypes2, prototypes_labels2)
    out2a = supcon_mean_loss(features2, labels2, prototypes2, prototypes_labels2,
                             tile_p=128)       # 3 tiles of 128
    out2b = supcon_mean_loss(features2, labels2, prototypes2, prototypes_labels2)
    jax.block_until_ready((out2a, out2b))
    assert jnp.allclose(out2a, ref2, rtol=2e-2, atol=2e-2), (out2a, ref2)
    # Different tilings of the same problem must agree tightly (tiling/padding
    # consistency check, independent of matmul-precision slack vs the ref).
    assert jnp.allclose(out2a, out2b, rtol=1e-5, atol=1e-5), (out2a, out2b)

    print("KERNEL_OK")
</pallas_src>

<mosaic_0001>
module attributes {stable_mosaic.version = 11 : i64} {
  func.func @_supcon_mean_loss_kernel(%arg0: i32, %arg1: memref<8x32xf32, #tpu.memory_space<vmem>>, %arg2: memref<128x32xf32, #tpu.memory_space<vmem>>, %arg3: memref<8x1xi32, #tpu.memory_space<vmem>>, %arg4: memref<1x128xi32, #tpu.memory_space<vmem>>, %arg5: memref<8x1xf32, #tpu.memory_space<vmem>>, %arg6: memref<1x128xf32, #tpu.memory_space<vmem>>, %arg7: memref<1x128xf32, #tpu.memory_space<vmem>>) attributes {dimension_semantics = [#tpu.dimension_semantics<parallel>], iteration_bounds = array<i64: 1>, scalar_prefetch = 0 : i64, scratch_operands = 0 : i64, tpu.core_type = #tpu.core_type<tc>, window_params = [{pipeline_mode = #tpu.pipeline_mode<synchronous>, transform_indices = @transform_0, window_bounds = array<i64: 8, 32>}, {transform_indices = @transform_1, window_bounds = array<i64: 128, 32>}, {pipeline_mode = #tpu.pipeline_mode<synchronous>, transform_indices = @transform_2, window_bounds = array<i64: 8, 1>}, {transform_indices = @transform_3, window_bounds = array<i64: 1, 128>}, {pipeline_mode = #tpu.pipeline_mode<synchronous>, transform_indices = @transform_4, window_bounds = array<i64: 8, 1>}, {transform_indices = @transform_5, window_bounds = array<i64: 1, 128>}, {transform_indices = @transform_6, window_bounds = array<i64: 1, 128>}]} {
    %c0 = arith.constant 0 : index
    %c0_0 = arith.constant 0 : index
    %0 = vector.load %arg1[%c0, %c0_0] : memref<8x32xf32, #tpu.memory_space<vmem>>, vector<8x32xf32>
    %c0_1 = arith.constant 0 : index
    %c0_2 = arith.constant 0 : index
    %1 = vector.load %arg2[%c0_1, %c0_2] : memref<128x32xf32, #tpu.memory_space<vmem>>, vector<128x32xf32>
    %cst = arith.constant dense<0.000000e+00> : vector<8x128xf32>
    %2 = tpu.matmul %0, %1, %cst {dimension_numbers = #tpu.dot_dimension_numbers<[1], [1], [0], [0], [0, 0, 1, 0], [], []>} : vector<8x32xf32>, vector<128x32xf32>, vector<8x128xf32> -> vector<8x128xf32>
    %c0_3 = arith.constant 0 : index
    %c0_4 = arith.constant 0 : index
    %3 = vector.load %arg5[%c0_3, %c0_4] : memref<8x1xf32, #tpu.memory_space<vmem>>, vector<8x1xf32>
    %4 = vector.broadcast %3 : vector<8x1xf32> to vector<8x128xf32>
    %5 = arith.addf %2, %4 : vector<8x128xf32>
    %c0_5 = arith.constant 0 : index
    %c0_6 = arith.constant 0 : index
    %6 = vector.load %arg3[%c0_5, %c0_6] : memref<8x1xi32, #tpu.memory_space<vmem>>, vector<8x1xi32>
    %c0_7 = arith.constant 0 : index
    %c0_8 = arith.constant 0 : index
    %7 = vector.load %arg4[%c0_7, %c0_8] : memref<1x128xi32, #tpu.memory_space<vmem>>, vector<1x128xi32>
    %8 = vector.broadcast %6 : vector<8x1xi32> to vector<8x128xi32>
    %9 = vector.broadcast %7 : vector<1x128xi32> to vector<8x128xi32>
    %10 = arith.cmpi eq, %8, %9 : vector<8x128xi32>
    %11 = arith.extui %10 : vector<8x128xi1> to vector<8x128xi32>
    %12 = arith.sitofp %11 : vector<8x128xi32> to vector<8x128xf32>
    %cst_9 = arith.constant dense<0xFF800000> : vector<128xf32>
    %13 = vector.multi_reduction <maximumf>, %5, %cst_9 [0] : vector<8x128xf32> to vector<128xf32>
    %14 = vector.shape_cast %13 : vector<128xf32> to vector<1x128xf32>
    %15 = vector.broadcast %14 : vector<1x128xf32> to vector<8x128xf32>
    %16 = arith.subf %5, %15 : vector<8x128xf32>
    %17 = math.exp %16 : vector<8x128xf32>
    %cst_10 = arith.constant dense<0.000000e+00> : vector<128xf32>
    %18 = vector.multi_reduction <add>, %17, %cst_10 [0] : vector<8x128xf32> to vector<128xf32>
    %19 = vector.shape_cast %18 : vector<128xf32> to vector<1x128xf32>
    %20 = math.log %19 : vector<1x128xf32>
    %21 = arith.addf %20, %14 : vector<1x128xf32>
    %cst_11 = arith.constant dense<0.000000e+00> : vector<128xf32>
    %22 = vector.multi_reduction <add>, %12, %cst_11 [0] : vector<8x128xf32> to vector<128xf32>
    %23 = vector.shape_cast %22 : vector<128xf32> to vector<1x128xf32>
    %cst_12 = arith.constant 0.000000e+00 : f32
    %24 = vector.broadcast %cst_12 : f32 to vector<1x128xf32>
    %25 = arith.cmpf ogt, %23, %24 : vector<1x128xf32>
    %26 = arith.extui %25 : vector<1x128xi1> to vector<1x128xi32>
    %27 = arith.sitofp %26 : vector<1x128xi32> to vector<1x128xf32>
    %28 = arith.mulf %12, %5 : vector<8x128xf32>
    %cst_13 = arith.constant dense<0.000000e+00> : vector<128xf32>
    %29 = vector.multi_reduction <add>, %28, %cst_13 [0] : vector<8x128xf32> to vector<128xf32>
    %30 = vector.shape_cast %29 : vector<128xf32> to vector<1x128xf32>
    %cst_14 = arith.constant 1.000000e+00 : f32
    %31 = vector.broadcast %cst_14 : f32 to vector<1x128xf32>
    %32 = arith.maximumf %23, %31 : vector<1x128xf32>
    %33 = tpu.reciprocal %32 : vector<1x128xf32> -> vector<1x128xf32>
    %34 = arith.mulf %23, %21 : vector<1x128xf32>
    %35 = arith.subf %30, %34 : vector<1x128xf32>
    %36 = arith.mulf %35, %33 : vector<1x128xf32>
    %cst_15 = arith.constant -1.000000e+00 : f32
    %37 = vector.broadcast %cst_15 : f32 to vector<1x128xf32>
    %38 = arith.mulf %27, %37 : vector<1x128xf32>
    %39 = arith.mulf %38, %36 : vector<1x128xf32>
    %c0_16 = arith.constant 0 : index
    %c0_17 = arith.constant 0 : index
    %40 = vector.load %arg6[%c0_16, %c0_17] : memref<1x128xf32, #tpu.memory_space<vmem>>, vector<1x128xf32>
    tpu.vector_store %arg6[%c0_16, %c0_17], %39 {strides = array<i32>} : memref<1x128xf32, #tpu.memory_space<vmem>>, vector<1x128xf32>,
    %c0_18 = arith.constant 0 : index
    %c0_19 = arith.constant 0 : index
    %41 = vector.load %arg7[%c0_18, %c0_19] : memref<1x128xf32, #tpu.memory_space<vmem>>, vector<1x128xf32>
    tpu.vector_store %arg7[%c0_18, %c0_19], %27 {strides = array<i32>} : memref<1x128xf32, #tpu.memory_space<vmem>>, vector<1x128xf32>,
    return
  }
  func.func @transform_0(%arg0: i32) -> (i32, i32) {
    %c0_i32 = arith.constant 0 : i32
    %c0_i32_0 = arith.constant 0 : i32
    %c0_i32_1 = arith.constant 0 : i32
    return %c0_i32, %c0_i32_0 : i32, i32
  }
  func.func @transform_1(%arg0: i32) -> (i32, i32) {
    %c0_i32 = arith.constant 0 : i32
    %c0_i32_0 = arith.constant 0 : i32
    return %arg0, %c0_i32 : i32, i32
  }
  func.func @transform_2(%arg0: i32) -> (i32, i32) {
    %c0_i32 = arith.constant 0 : i32
    %c0_i32_0 = arith.constant 0 : i32
    %c0_i32_1 = arith.constant 0 : i32
    return %c0_i32, %c0_i32_0 : i32, i32
  }
  func.func @transform_3(%arg0: i32) -> (i32, i32) {
    %c0_i32 = arith.constant 0 : i32
    %c0_i32_0 = arith.constant 0 : i32
    return %c0_i32, %arg0 : i32, i32
  }
  func.func @transform_4(%arg0: i32) -> (i32, i32) {
    %c0_i32 = arith.constant 0 : i32
    %c0_i32_0 = arith.constant 0 : i32
    %c0_i32_1 = arith.constant 0 : i32
    return %c0_i32, %c0_i32_0 : i32, i32
  }
  func.func @transform_5(%arg0: i32) -> (i32, i32) {
    %c0_i32 = arith.constant 0 : i32
    %c0_i32_0 = arith.constant 0 : i32
    return %c0_i32, %arg0 : i32, i32
  }
  func.func @transform_6(%arg0: i32) -> (i32, i32) {
    %c0_i32 = arith.constant 0 : i32
    %c0_i32_0 = arith.constant 0 : i32
    return %c0_i32, %arg0 : i32, i32
  }
}

</mosaic_0001>

<bundles_post_ra>
// kernel: tpu_custom_call.1
= control target key start
LH: loop header
LB: loop body
LE: loop exit
PB: predicated region body
PF: predicated region fallthrough
CT: control target
= control target key end

     0   :  { %12 = vsyncpa [#allocation3], 0  ;;  %vm47_vm0 = vcmask 261120   ;;  %v417_v2 = vmov 0.0|0.0   ;;  %vm418_vm2 = vmmov 0   ;;  %v419_v5 = vmov 0.0   ;;  %s565_s0 = inlined_call_operand.vmem [shape: f32[8,32], index: 0, kind: input, shape index: {}]   ;;  %s566_s1 = inlined_call_operand.vmem [shape: f32[128,32], index: 1, kind: input, shape index: {}]   ;;  %s567_s2 = inlined_call_operand.vmem [shape: s32[8,1], index: 2, kind: input, shape index: {}]   ;;  %s568_s3 = inlined_call_operand.vmem [shape: s32[1,128], index: 3, kind: input, shape index: {}]   ;;  %s569_s4 = inlined_call_operand.vmem [shape: f32[8,1], index: 4, kind: input, shape index: {}]   ;;  %s570_s5 = inlined_call_operand.hbm [shape: f32[1,128], index: 5, kind: output, shape index: {0}]   ;;  %s571_s6 = inlined_call_operand.hbm [shape: f32[1,128], index: 6, kind: output, shape index: {1}]  }
   0x1   :  { %v25_v0 = vld [vmem:[%s566_s1] sm:$0xff]  ;;  %v26_v1 = vld [vmem:[%s566_s1 + $0x8] sm:$0xff]  ;;  %324 = vmatprep.subr.bf16.mxu0 %v417_v2  ;;  %vm466_vm1 = vmpackc.low %vm47_vm0, %vm47_vm0  ;;  %321 = vmatprep.mubr.msk.f32.mxu0 %vm418_vm2, %v419_v5  ;;  %v420_v6 = vmov 0  }
   0x2   :  { %v325_v3 = vpack.c.bf16 %v26_v1, %v25_v0  ;;  %362 = vset.pattern.permute.xlu0 %v420_v6  ;;  %v27_v7 = vld [vmem:[%s566_s1 + $0x10] sm:$0xff]  ;;  %v28_v8 = vld [vmem:[%s566_s1 + $0x18] sm:$0xff]  ;;  %v41_v9 = vld [vmem:[%s569_s4] sm:$0xff] }
   0x3   :  { %v329_v10 = vpack.c.bf16 %v28_v8, %v27_v7  ;;  %44 = vperm.xlu0 %362, %v41_v9  }
   0x4   :  { %327 = vmatpush3.bf16.xpose.msk.msra.mxu0 %vm466_vm1, %v325_v3 }
   0x5   :  { %328 = vmatprep.subr.bf16.mxu0 %v417_v2 }
   0x6   :  { %13 = vsyncpa [#allocation5], 0  ;;  %v169_v11 = vld [vmem:[%s567_s2] sm:$0xff]  ;;  %v30_v13 = vld [vmem:[%s566_s1 + $0x28] sm:$0xff] }
   0x7   :  { %172 = vperm.xlu0 %362, %v169_v11   ;;  %v29_v12 = vld [vmem:[%s566_s1 + $0x20] sm:$0xff]  ;;  %v31_v15 = vld [vmem:[%s566_s1 + $0x30] sm:$0xff]  ;;  %v32_v16 = vld [vmem:[%s566_s1 + $0x38] sm:$0xff] }
   0x8   :  { %v333_v14 = vpack.c.bf16 %v30_v13, %v29_v12  ;;  %v337_v17 = vpack.c.bf16 %v32_v16, %v31_v15  ;;  %v33_v18 = vld [vmem:[%s566_s1 + $0x40] sm:$0xff]  ;;  %v34_v19 = vld [vmem:[%s566_s1 + $0x48] sm:$0xff]  ;;  %v35_v21 = vld [vmem:[%s566_s1 + $0x50] sm:$0xff] }
   0x9   :  { %v341_v20 = vpack.c.bf16 %v34_v19, %v33_v18  ;;  %v36_v22 = vld [vmem:[%s566_s1 + $0x58] sm:$0xff]  ;;  %v37_v24 = vld [vmem:[%s566_s1 + $0x60] sm:$0xff]  ;;  %v38_v25 = vld [vmem:[%s566_s1 + $0x68] sm:$0xff] }
   0xa   :  { %v345_v23 = vpack.c.bf16 %v36_v22, %v35_v21  ;;  %v349_v26 = vpack.c.bf16 %v38_v25, %v37_v24  ;;  %v39_v27 = vld [vmem:[%s566_s1 + $0x70] sm:$0xff]  ;;  %v40_v28 = vld [vmem:[%s566_s1 + $0x78] sm:$0xff]  ;;  %v24_v30 = vld [vmem:[%s565_s0] sm:$0xff]  ;;  %s421_s0 = smov [#allocation4]  }
   0xb   :  { %v353_v29 = vpack.c.bf16 %v40_v28, %v39_v27  ;;  %v269_v32 = vld [vmem:[%s568_s3] ss:$0 sm:$0xff]  ;;  %s240_s1 = sshll.u32 %s421_s0, 4  ;;  %s241_s1 = int_to_ptr.vmem [resolvable:$true] %s240_s1 }
   0xc   :  { %331 = vmatpush3.bf16.xpose.msk.msra.mxu0 %vm466_vm1, %v329_v10  ;;  %s369_s11 = scalar_lea.vmem %s241_s1, 16  ;;  %s373_s12 = scalar_lea.vmem %s241_s1, 32 }
   0xd   :  { %332 = vmatprep.subr.bf16.mxu0 %v417_v2  ;;  %p370_p0 = scmp.ne.s32.totalorder %s241_s1, %s369_s11  ;;  %p374_p1 = scmp.lt.s32.totalorder %s241_s1, %s241_s1 }
   0xe   :  { %p375_p2 = scmp.lt.s32.totalorder %s373_s12, %s369_s11 }
  0x10   :  { %p376_p3 = por %p375_p2, %p374_p1 }
  0x12   :  { %p377_p4 = pnand %p376_p3, %p370_p0 }
  0x14   :  { %335 = vmatpush3.bf16.xpose.msk.msra.mxu0 %vm466_vm1, %v333_v14 }
  0x15   :  { %336 = vmatprep.subr.bf16.mxu0 %v417_v2 }
  0x1c   :  { %339 = vmatpush3.bf16.xpose.msk.msra.mxu0 %vm466_vm1, %v337_v17 }
  0x1d   :  { %340 = vmatprep.subr.bf16.mxu0 %v417_v2 }
  0x24   :  { %343 = vmatpush3.bf16.xpose.msk.msra.mxu0 %vm466_vm1, %v341_v20 }
  0x25   :  { %344 = vmatprep.subr.bf16.mxu0 %v417_v2 }
  0x2c   :  { %347 = vmatpush3.bf16.xpose.msk.msra.mxu0 %vm466_vm1, %v345_v23 }
  0x2d   :  { %348 = vmatprep.subr.bf16.mxu0 %v417_v2 }
  0x34   :  { %351 = vmatpush3.bf16.xpose.msk.msra.mxu0 %vm466_vm1, %v349_v26 }
  0x35   :  { %352 = vmatprep.subr.bf16.mxu0 %v417_v2 }
  0x3c   :  { %355 = vmatpush3.bf16.xpose.msk.msra.mxu0 %vm466_vm1, %v353_v29 }
  0x43   :  { %322 = vmatmul.mubr.msk.f32.vlgmr.msra.gmra.mrb[0].mxu0 %vm47_vm0, %v24_v30 }
  0x82   :  { %v45_v31 = vpop.permute.xlu0 %44 }
  0x86   :  { %v173_v33 = vpop.permute.xlu0 %172 }
  0x87   :  { %vm178_vm3 = vcmp.eq.s32.totalorder %v173_v33, %v269_v32 }
  0x88   :  { %v270_v34 = vsel %vm178_vm3, 1.0, %v419_v5 }
  0x89   :  { %v199_v35 = vrot.slane %v270_v34, 4 }
  0x8b   :  { %v200_v36 = vadd.f32 %v270_v34, %v199_v35 }
  0x8d   :  { %v201_v37 = vrot.slane %v200_v36, 2 }
  0x8f   :  { %v202_v38 = vadd.f32 %v201_v37, %v200_v36 }
  0x91   :  { %v203_v39 = vrot.slane %v202_v38, 1 }
  0x93   :  { %v204_v40 = vadd.f32 %v203_v39, %v202_v38 }
  0x95   :  { %vm205_vm4 = vcmp.gt.f32.partialorder %v204_v40, 0.0 }
  0x96   :  { %v271_v41 = vsel %vm205_vm4, 1.0, %v419_v5 }
  0x97   :  { %223 = vst [vmem:[#allocation4] sm:$0x1] %v271_v41 }
  0x98   :  { %380 = shalt.err (!%p377_p4)
}
  0x99   :  { %s381_s2 = scalar_lea.hbm %s571_s6, 16 }
  0x9a   :  { %p382_p5 = scmp.ne.s32.totalorder %s571_s6, %s381_s2  ;;  %p385_p6 = scmp.lt.u32.totalorder %s381_s2, %s571_s6 }
  0x9c   :  { %p387_p7 = pnand %p385_p6, %p382_p5 }
  0x9e   :  { %390 = shalt.err (!%p387_p7)
}
  0x9f   :  { %243 = dma.vmem_to_hbm [thread:$0]  %s241_s1, 16, %s571_s6, [#allocation5]   ;;  %v215_v0 = vmax.f32 %v204_v40, 1.0  ;;  %v220_v11 = vmul.f32 -1.0, %v271_v41 }
  0xa0   :  { %s422_s6 = smov [#allocation2]  }
  0xa1   :  { %s230_s19 = sshll.u32 %s422_s6, 4  ;;  %s231_s19 = int_to_ptr.vmem [resolvable:$true] %s230_s19 }
  0xa2   :  { %s391_s20 = scalar_lea.vmem %s231_s19, 16  ;;  %s395_s21 = scalar_lea.vmem %s231_s19, 32 }
  0xa3   :  { %p392_p8 = scmp.ne.s32.totalorder %s231_s19, %s391_s20  ;;  %p396_p9 = scmp.lt.s32.totalorder %s231_s19, %s231_s19 }
  0xa4   :  { %p397_p10 = scmp.lt.s32.totalorder %s395_s21, %s391_s20 }
  0xa6   :  { %p398_p11 = por %p397_p10, %p396_p9 }
  0xa8   :  { %p399_p12 = pnand %p398_p11, %p392_p8 }
 0x116   :  { %v165_v42 = vpop.f32.mrb[0].mxu0 }
 0x117   :  { %v166_v43 = vadd.f32 %v165_v42, %v45_v31  ;;  %v323_v44 = vpop.f32.mrb[1].mxu0 }
 0x119   :  { %v181_v45 = vrot.slane %v166_v43, 4  ;;  %v208_v56 = vmul.f32 %v270_v34, %v166_v43 }
 0x11b   :  { %v182_v46 = vmax.f32 %v166_v43, %v181_v45  ;;  %v209_v59 = vrot.slane %v208_v56, 4 }
 0x11d   :  { %v183_v47 = vrot.slane %v182_v46, 2  ;;  %v210_v62 = vadd.f32 %v209_v59, %v208_v56 }
 0x11f   :  { %v184_v48 = vmax.f32 %v182_v46, %v183_v47  ;;  %v211_v63 = vrot.slane %v210_v62, 2 }
 0x121   :  { %v185_v49 = vrot.slane %v184_v48, 1  ;;  %v212_v1 = vadd.f32 %v211_v63, %v210_v62 }
 0x123   :  { %v186_v50 = vmax.f32 %v184_v48, %v185_v49  ;;  %v213_v4 = vrot.slane %v212_v1, 1 }
 0x125   :  { %v187_v51 = vsub.f32 %v166_v43, %v186_v50  ;;  %v214_v6 = vadd.f32 %v213_v4, %v212_v1 }
 0x127   :  { %v188_v52 = vmul.f32 1.442695, %v187_v51 }
 0x129   :  { %363 = vpow2.f32 %v188_v52 }
 0x133   :  { %v364_v53 = vpop.eup %363 }
 0x134   :  { %v190_v54 = vrot.slane %v364_v53, 4 }
 0x136   :  { %v191_v55 = vadd.f32 %v364_v53, %v190_v54 }
 0x138   :  { %v192_v57 = vrot.slane %v191_v55, 2 }
 0x13a   :  { %v193_v58 = vadd.f32 %v192_v57, %v191_v55 }
 0x13c   :  { %v194_v60 = vrot.slane %v193_v58, 1 }
 0x13e   :  { %v195_v61 = vadd.f32 %v194_v60, %v193_v58 }
 0x140   :  { %365 = vlog2.f32 %v195_v61 }
 0x141   :  { %367 = vrcp.f32 %v215_v0 }
 0x14a   :  { %v366_v2 = vpop.eup %365 }
 0x14b   :  { %v197_v3 = vmul.f32 0.6931472, %v366_v2  ;;  %v368_v9 = vpop.eup %367 }
 0x14d   :  { %v198_v5 = vadd.f32 %v197_v3, %v186_v50 }
 0x14f   :  { %v217_v7 = vmul.f32 %v204_v40, %v198_v5 }
 0x151   :  { %v218_v8 = vsub.f32 %v214_v6, %v217_v7 }
 0x153   :  { %v219_v10 = vmul.f32 %v368_v9, %v218_v8 }
 0x155   :  { %v221_v12 = vmul.f32 %v220_v11, %v219_v10 }
 0x157   :  { %222 = vst [vmem:[#allocation2] sm:$0x1] %v221_v12 }
 0x158   :  { %402 = shalt.err (!%p399_p12)
}
 0x159   :  { %s403_s24 = scalar_lea.hbm %s570_s5, 16 }
 0x15a   :  { %p404_p13 = scmp.ne.s32.totalorder %s570_s5, %s403_s24  ;;  %p407_p0 = scmp.lt.u32.totalorder %s403_s24, %s570_s5 }
 0x15c   :  { %p409_p1 = pnand %p407_p0, %p404_p13 }
 0x15e   :  { %412 = shalt.err (!%p409_p1)
}
 0x15f   :  { %233 = dma.vmem_to_hbm [thread:$0]  %s231_s19, 16, %s570_s5, [#allocation3]  }
 0x160   :  { %413 = dma.done.wait [#allocation3], 16  }
 0x161   :  { %414 = vsyncadd [#allocation3], 4294967280 }
 0x162   :  { %415 = dma.done.wait [#allocation5], 16  }
 0x163   :  { %416 = vsyncadd [#allocation5], 4294967280 }
 0x164   :  { %250 = vsyncpa [#allocation3], 1 }
 0x165   :  { %251 = vsyncpa [#allocation5], 1 }

</bundles_post_ra>
